<compile_context>
chip_gen: v5e
topology: v5e:2x2
jax: 0.10.0
libtpu: 0.0.40
codegen_flags: <defaults>
</compile_context>

<pallas_src>
import jax
import jax.numpy as jnp
from jax import lax
from jax.experimental import pallas as pl
from jax.experimental.pallas import tpu as pltpu


# ----------------------------------------------------------------------------
# Kernel 1: fused (space-to-depth) conv + per-batch BN partial statistics
# ----------------------------------------------------------------------------
def _conv_stats_kernel(x_ref, w_ref, y_ref, st_ref):
    # x_ref : (1, OH+1, OW+1, 4*Ci)  bf16   s2d padded input, one batch image
    # w_ref : (4, 4*Ci, Co)          bf16   weights, one slab per 2x2 s2d tap
    # y_ref : (1, OH*OW, Co)         f32    conv output rows for this image
    # st_ref: (1, 2, Co)             f32    [col sum, col sum-of-squares]
    oh = x_ref.shape[1] - 1
    ow = x_ref.shape[2] - 1
    co = y_ref.shape[2]

    x = x_ref[0]                                     # (OH+1, OW+1, 4*Ci)
    acc = jnp.zeros((oh * ow, co), jnp.float32)
    for p in range(4):                               # unrolled 2x2 s2d taps
        di, dj = p // 2, p % 2
        win = x[di:di + oh, dj:dj + ow, :]           # (OH, OW, 4*Ci)
        win = win.reshape(oh * ow, -1)               # (OH*OW, 4*Ci)
        acc = acc + jnp.dot(win, w_ref[p],
                            preferred_element_type=jnp.float32)

    y_ref[0] = acc
    st_ref[0, 0:1, :] = jnp.sum(acc, axis=0, keepdims=True)
    st_ref[0, 1:2, :] = jnp.sum(acc * acc, axis=0, keepdims=True)


# ----------------------------------------------------------------------------
# Kernel 2: folded BatchNorm affine + LeakyReLU(0.2)
# ----------------------------------------------------------------------------
def _bn_lrelu_kernel(y_ref, ss_ref, o_ref):
    # y_ref: (1, OH*OW, Co) f32; ss_ref: (2, Co) f32 = [scale, shift]
    y = y_ref[0]
    z = y * ss_ref[0:1, :] + ss_ref[1:2, :]
    o_ref[0] = jnp.where(z > 0, z, 0.2 * z)


# ----------------------------------------------------------------------------
# Forward pass
# ----------------------------------------------------------------------------
def down_forward(x_nchw, params):
    """x_nchw: (B, Ci, H, W) -> (B, Co, H//2, W//2), like the PyTorch Down."""
    w, gamma, beta = params["w"], params["gamma"], params["beta"]
    co, ci, kh, kw = w.shape
    B, C, H, W = x_nchw.shape
    assert C == ci and kh == 4 and kw == 4 and H % 2 == 0 and W % 2 == 0
    OH, OW = H // 2, W // 2
    Hp, Wp = H + 2, W + 2                       # pad=1 on each side (even)
    M_b = OH * OW

    # ---- layout prep (pure layout transforms, no read amplification) -------
    x = jnp.transpose(x_nchw, (0, 2, 3, 1)).astype(jnp.float32)     # NHWC
    xp = jnp.pad(x, ((0, 0), (1, 1), (1, 1), (0, 0)))
    # space-to-depth by 2; channel packing order = (pi, pj, c)
    xs = xp.reshape(B, Hp // 2, 2, Wp // 2, 2, C)
    xs = jnp.transpose(xs, (0, 1, 3, 2, 4, 5))
    xs = xs.reshape(B, Hp // 2, Wp // 2, 4 * C).astype(jnp.bfloat16)

    # weights: (Co,Ci,4,4) -> (KH,KW,Ci,Co) -> per 2x2 tap: (4*Ci, Co)
    wt = jnp.transpose(w, (2, 3, 1, 0))
    wk = jnp.stack([wt[2 * di:2 * di + 2, 2 * dj:2 * dj + 2].reshape(4 * ci, co)
                    for di in (0, 1) for dj in (0, 1)], axis=0)
    wk = wk.astype(jnp.bfloat16)                                    # (4,4Ci,Co)

    # ---- kernel 1: conv + per-batch BN partial stats -----------------------
    y, stats = pl.pallas_call(
        _conv_stats_kernel,
        out_shape=(jax.ShapeDtypeStruct((B, M_b, co), jnp.float32),
                   jax.ShapeDtypeStruct((B, 2, co), jnp.float32)),
        grid_spec=pltpu.PrefetchScalarGridSpec(
            num_scalar_prefetch=0,
            grid=(B,),
            in_specs=[
                pl.BlockSpec((1, Hp // 2, Wp // 2, 4 * C),
                             lambda b: (b, 0, 0, 0)),
                pl.BlockSpec((4, 4 * ci, co), lambda b: (0, 0, 0)),
            ],
            out_specs=[
                pl.BlockSpec((1, M_b, co), lambda b: (b, 0, 0)),
                pl.BlockSpec((1, 2, co), lambda b: (b, 0, 0)),
            ]),
        compiler_params=pltpu.CompilerParams(
            dimension_semantics=("parallel",),
            vmem_limit_bytes=32 * 1024 * 1024),
    )(xs, wk)

    # ---- tiny glue: global BN stats -> folded scale / shift ----------------
    s = jnp.sum(stats, axis=0)                      # (2, Co)
    n = jnp.float32(B * M_b)
    mean = s[0] / n
    var = s[1] / n - mean * mean                    # biased var (training BN)
    scale = gamma * lax.rsqrt(var + 1e-5)
    shift = beta - mean * scale
    ss = jnp.stack([scale, shift], axis=0).astype(jnp.float32)      # (2, Co)

    # ---- kernel 2: BN affine + LeakyReLU ------------------------------------
    out = pl.pallas_call(
        _bn_lrelu_kernel,
        out_shape=jax.ShapeDtypeStruct((B, M_b, co), jnp.float32),
        grid_spec=pltpu.PrefetchScalarGridSpec(
            num_scalar_prefetch=0,
            grid=(B,),
            in_specs=[
                pl.BlockSpec((1, M_b, co), lambda b: (b, 0, 0)),
                pl.BlockSpec((2, co), lambda b: (0, 0)),
            ],
            out_specs=pl.BlockSpec((1, M_b, co), lambda b: (b, 0, 0))),
        compiler_params=pltpu.CompilerParams(
            dimension_semantics=("parallel",)),
    )(y, ss)

    return jnp.transpose(out.reshape(B, OH, OW, co), (0, 3, 1, 2))  # NCHW


# ----------------------------------------------------------------------------
# Pure-JAX reference (f32) for a correctness spot-check
# ----------------------------------------------------------------------------
def down_reference(x_nchw, params):
    w, gamma, beta = params["w"], params["gamma"], params["beta"]
    x = jnp.transpose(x_nchw, (0, 2, 3, 1)).astype(jnp.float32)
    wt = jnp.transpose(w, (2, 3, 1, 0))
    y = lax.conv_general_dilated(
        x, wt, window_strides=(2, 2), padding=((1, 1), (1, 1)),
        dimension_numbers=("NHWC", "HWIO", "NHWC"),
        precision=lax.Precision.HIGHEST)
    mean = jnp.mean(y, axis=(0, 1, 2))
    var = jnp.mean((y - mean) ** 2, axis=(0, 1, 2))
    z = (y - mean) * lax.rsqrt(var + 1e-5) * gamma + beta
    z = jnp.where(z > 0, z, 0.2 * z)
    return jnp.transpose(z, (0, 3, 1, 2))


def init_down_params(key, ic=4, oc=16):
    k1, k2, k3 = jax.random.split(key, 3)
    return {
        "w": jax.random.normal(k1, (oc, ic, 4, 4), jnp.float32) * 0.05,
        "gamma": 1.0 + 0.1 * jax.random.normal(k2, (oc,), jnp.float32),
        "beta": 0.1 * jax.random.normal(k3, (oc,), jnp.float32),
    }


# ----------------------------------------------------------------------------
if __name__ == "__main__":
    key = jax.random.PRNGKey(0)
    kp, kx = jax.random.split(key)

    B, C, H, W = 2, 4, 16, 16
    OC = 16
    params = init_down_params(kp, ic=C, oc=OC)
    x = jax.random.normal(kx, (B, C, H, W), jnp.float32)

    fwd = jax.jit(down_forward)
    out = jax.block_until_ready(fwd(x, params))

    assert out.shape == (B, OC, H // 2, W // 2), out.shape
    assert bool(jnp.all(jnp.isfinite(out)))

    ref = down_reference(x, params)
    err = float(jnp.max(jnp.abs(out - ref)))
    assert err < 1e-1, f"max abs err vs reference: {err}"

    print("KERNEL_OK")
</pallas_src>

<mosaic_0001>
module attributes {stable_mosaic.version = 11 : i64} {
  func.func @_bn_lrelu_kernel(%arg0: i32, %arg1: memref<1x64x16xf32, #tpu.memory_space<vmem>>, %arg2: memref<2x16xf32, #tpu.memory_space<vmem>>, %arg3: memref<1x64x16xf32, #tpu.memory_space<vmem>>) attributes {dimension_semantics = [#tpu.dimension_semantics<parallel>], iteration_bounds = array<i64: 2>, scalar_prefetch = 0 : i64, scratch_operands = 0 : i64, tpu.core_type = #tpu.core_type<tc>, window_params = [{transform_indices = @transform_0, window_bounds = array<i64: 1, 64, 16>}, {pipeline_mode = #tpu.pipeline_mode<synchronous>, transform_indices = @transform_1, window_bounds = array<i64: 2, 16>}, {transform_indices = @transform_2, window_bounds = array<i64: 1, 64, 16>}]} {
    %c0 = arith.constant 0 : index
    %c0_0 = arith.constant 0 : index
    %c0_1 = arith.constant 0 : index
    %0 = vector.load %arg1[%c0, %c0_0, %c0_1] : memref<1x64x16xf32, #tpu.memory_space<vmem>>, vector<1x64x16xf32>
    %1 = vector.shape_cast %0 : vector<1x64x16xf32> to vector<64x16xf32>
    %c0_2 = arith.constant 0 : index
    %c0_3 = arith.constant 0 : index
    %2 = vector.load %arg2[%c0_2, %c0_3] : memref<2x16xf32, #tpu.memory_space<vmem>>, vector<1x16xf32>
    %3 = vector.broadcast %2 : vector<1x16xf32> to vector<64x16xf32>
    %4 = arith.mulf %1, %3 : vector<64x16xf32>
    %c1 = arith.constant 1 : index
    %c0_4 = arith.constant 0 : index
    %5 = vector.load %arg2[%c1, %c0_4] : memref<2x16xf32, #tpu.memory_space<vmem>>, vector<1x16xf32>
    %6 = vector.broadcast %5 : vector<1x16xf32> to vector<64x16xf32>
    %7 = arith.addf %4, %6 : vector<64x16xf32>
    %cst = arith.constant 0.000000e+00 : f32
    %8 = vector.broadcast %cst : f32 to vector<64x16xf32>
    %9 = arith.cmpf ogt, %7, %8 : vector<64x16xf32>
    %cst_5 = arith.constant 2.000000e-01 : f32
    %10 = vector.broadcast %cst_5 : f32 to vector<64x16xf32>
    %11 = arith.mulf %10, %7 : vector<64x16xf32>
    %12 = arith.select %9, %7, %11 : vector<64x16xi1>, vector<64x16xf32>
    %c0_6 = arith.constant 0 : index
    %c0_7 = arith.constant 0 : index
    %c0_8 = arith.constant 0 : index
    %13 = vector.load %arg3[%c0_6, %c0_7, %c0_8] : memref<1x64x16xf32, #tpu.memory_space<vmem>>, vector<1x64x16xf32>
    %14 = vector.shape_cast %13 : vector<1x64x16xf32> to vector<64x16xf32>
    %15 = vector.shape_cast %12 : vector<64x16xf32> to vector<1x64x16xf32>
    tpu.vector_store %arg3[%c0_6, %c0_7, %c0_8], %15 {strides = array<i32>} : memref<1x64x16xf32, #tpu.memory_space<vmem>>, vector<1x64x16xf32>,
    return
  }
  func.func @transform_0(%arg0: i32) -> (i32, i32, i32) {
    %c0_i32 = arith.constant 0 : i32
    %c0_i32_0 = arith.constant 0 : i32
    %c0_i32_1 = arith.constant 0 : i32
    return %arg0, %c0_i32, %c0_i32_0 : i32, i32, i32
  }
  func.func @transform_1(%arg0: i32) -> (i32, i32) {
    %c0_i32 = arith.constant 0 : i32
    %c0_i32_0 = arith.constant 0 : i32
    %c0_i32_1 = arith.constant 0 : i32
    return %c0_i32, %c0_i32_0 : i32, i32
  }
  func.func @transform_2(%arg0: i32) -> (i32, i32, i32) {
    %c0_i32 = arith.constant 0 : i32
    %c0_i32_0 = arith.constant 0 : i32
    %c0_i32_1 = arith.constant 0 : i32
    return %arg0, %c0_i32, %c0_i32_0 : i32, i32, i32
  }
}

module attributes {stable_mosaic.version = 11 : i64} {
  func.func @_conv_stats_kernel(%arg0: i32, %arg1: memref<1x9x9x16xbf16, #tpu.memory_space<vmem>>, %arg2: memref<4x16x16xbf16, #tpu.memory_space<vmem>>, %arg3: memref<1x64x16xf32, #tpu.memory_space<vmem>>, %arg4: memref<1x2x16xf32, #tpu.memory_space<vmem>>) attributes {dimension_semantics = [#tpu.dimension_semantics<parallel>], iteration_bounds = array<i64: 2>, scalar_prefetch = 0 : i64, scratch_operands = 0 : i64, tpu.core_type = #tpu.core_type<tc>, window_params = [{transform_indices = @transform_0, window_bounds = array<i64: 1, 9, 9, 16>}, {pipeline_mode = #tpu.pipeline_mode<synchronous>, transform_indices = @transform_1, window_bounds = array<i64: 4, 16, 16>}, {transform_indices = @transform_2, window_bounds = array<i64: 1, 64, 16>}, {transform_indices = @transform_3, window_bounds = array<i64: 1, 2, 16>}]} {
    %c0 = arith.constant 0 : index
    %c0_0 = arith.constant 0 : index
    %c0_1 = arith.constant 0 : index
    %c0_2 = arith.constant 0 : index
    %0 = vector.load %arg1[%c0, %c0_0, %c0_1, %c0_2] : memref<1x9x9x16xbf16, #tpu.memory_space<vmem>>, vector<1x9x9x16xbf16>
    %1 = vector.shape_cast %0 : vector<1x9x9x16xbf16> to vector<9x9x16xbf16>
    %cst = arith.constant 0.000000e+00 : f32
    %2 = vector.broadcast %cst : f32 to vector<64x16xf32>
    %3 = vector.extract_strided_slice %1 {offsets = [0, 0, 0], sizes = [8, 8, 16], strides = [1, 1, 1]} : vector<9x9x16xbf16> to vector<8x8x16xbf16>
    %4 = vector.shape_cast %3 : vector<8x8x16xbf16> to vector<64x16xbf16>
    %c0_3 = arith.constant 0 : index
    %c0_4 = arith.constant 0 : index
    %c0_5 = arith.constant 0 : index
    %5 = vector.load %arg2[%c0_3, %c0_4, %c0_5] : memref<4x16x16xbf16, #tpu.memory_space<vmem>>, vector<1x16x16xbf16>
    %6 = vector.shape_cast %5 : vector<1x16x16xbf16> to vector<16x16xbf16>
    %cst_6 = arith.constant dense<0.000000e+00> : vector<64x16xf32>
    %7 = tpu.matmul %4, %6, %cst_6 {dimension_numbers = #tpu.dot_dimension_numbers<[1], [0], [0], [1], [0, 0, 1, 1], [], []>} : vector<64x16xbf16>, vector<16x16xbf16>, vector<64x16xf32> -> vector<64x16xf32>
    %8 = arith.addf %2, %7 : vector<64x16xf32>
    %9 = vector.extract_strided_slice %1 {offsets = [0, 1, 0], sizes = [8, 8, 16], strides = [1, 1, 1]} : vector<9x9x16xbf16> to vector<8x8x16xbf16>
    %10 = vector.shape_cast %9 : vector<8x8x16xbf16> to vector<64x16xbf16>
    %c1 = arith.constant 1 : index
    %c0_7 = arith.constant 0 : index
    %c0_8 = arith.constant 0 : index
    %11 = vector.load %arg2[%c1, %c0_7, %c0_8] : memref<4x16x16xbf16, #tpu.memory_space<vmem>>, vector<1x16x16xbf16>
    %12 = vector.shape_cast %11 : vector<1x16x16xbf16> to vector<16x16xbf16>
    %cst_9 = arith.constant dense<0.000000e+00> : vector<64x16xf32>
    %13 = tpu.matmul %10, %12, %cst_9 {dimension_numbers = #tpu.dot_dimension_numbers<[1], [0], [0], [1], [0, 0, 1, 1], [], []>} : vector<64x16xbf16>, vector<16x16xbf16>, vector<64x16xf32> -> vector<64x16xf32>
    %14 = arith.addf %8, %13 : vector<64x16xf32>
    %15 = vector.extract_strided_slice %1 {offsets = [1, 0, 0], sizes = [8, 8, 16], strides = [1, 1, 1]} : vector<9x9x16xbf16> to vector<8x8x16xbf16>
    %16 = vector.shape_cast %15 : vector<8x8x16xbf16> to vector<64x16xbf16>
    %c2 = arith.constant 2 : index
    %c0_10 = arith.constant 0 : index
    %c0_11 = arith.constant 0 : index
    %17 = vector.load %arg2[%c2, %c0_10, %c0_11] : memref<4x16x16xbf16, #tpu.memory_space<vmem>>, vector<1x16x16xbf16>
    %18 = vector.shape_cast %17 : vector<1x16x16xbf16> to vector<16x16xbf16>
    %cst_12 = arith.constant dense<0.000000e+00> : vector<64x16xf32>
    %19 = tpu.matmul %16, %18, %cst_12 {dimension_numbers = #tpu.dot_dimension_numbers<[1], [0], [0], [1], [0, 0, 1, 1], [], []>} : vector<64x16xbf16>, vector<16x16xbf16>, vector<64x16xf32> -> vector<64x16xf32>
    %20 = arith.addf %14, %19 : vector<64x16xf32>
    %21 = vector.extract_strided_slice %1 {offsets = [1, 1, 0], sizes = [8, 8, 16], strides = [1, 1, 1]} : vector<9x9x16xbf16> to vector<8x8x16xbf16>
    %22 = vector.shape_cast %21 : vector<8x8x16xbf16> to vector<64x16xbf16>
    %c3 = arith.constant 3 : index
    %c0_13 = arith.constant 0 : index
    %c0_14 = arith.constant 0 : index
    %23 = vector.load %arg2[%c3, %c0_13, %c0_14] : memref<4x16x16xbf16, #tpu.memory_space<vmem>>, vector<1x16x16xbf16>
    %24 = vector.shape_cast %23 : vector<1x16x16xbf16> to vector<16x16xbf16>
    %cst_15 = arith.constant dense<0.000000e+00> : vector<64x16xf32>
    %25 = tpu.matmul %22, %24, %cst_15 {dimension_numbers = #tpu.dot_dimension_numbers<[1], [0], [0], [1], [0, 0, 1, 1], [], []>} : vector<64x16xbf16>, vector<16x16xbf16>, vector<64x16xf32> -> vector<64x16xf32>
    %26 = arith.addf %20, %25 : vector<64x16xf32>
    %c0_16 = arith.constant 0 : index
    %c0_17 = arith.constant 0 : index
    %c0_18 = arith.constant 0 : index
    %27 = vector.load %arg3[%c0_16, %c0_17, %c0_18] : memref<1x64x16xf32, #tpu.memory_space<vmem>>, vector<1x64x16xf32>
    %28 = vector.shape_cast %27 : vector<1x64x16xf32> to vector<64x16xf32>
    %29 = vector.shape_cast %26 : vector<64x16xf32> to vector<1x64x16xf32>
    tpu.vector_store %arg3[%c0_16, %c0_17, %c0_18], %29 {strides = array<i32>} : memref<1x64x16xf32, #tpu.memory_space<vmem>>, vector<1x64x16xf32>,
    %cst_19 = arith.constant dense<0.000000e+00> : vector<16xf32>
    %30 = vector.multi_reduction <add>, %26, %cst_19 [0] : vector<64x16xf32> to vector<16xf32>
    %31 = vector.shape_cast %30 : vector<16xf32> to vector<1x16xf32>
    %c0_20 = arith.constant 0 : index
    %c0_21 = arith.constant 0 : index
    %c0_22 = arith.constant 0 : index
    %32 = vector.load %arg4[%c0_20, %c0_21, %c0_22] : memref<1x2x16xf32, #tpu.memory_space<vmem>>, vector<1x1x16xf32>
    %33 = vector.shape_cast %32 : vector<1x1x16xf32> to vector<1x16xf32>
    %34 = vector.shape_cast %31 : vector<1x16xf32> to vector<1x1x16xf32>
    tpu.vector_store %arg4[%c0_20, %c0_21, %c0_22], %34 {strides = array<i32>} : memref<1x2x16xf32, #tpu.memory_space<vmem>>, vector<1x1x16xf32>,
    %35 = arith.mulf %26, %26 : vector<64x16xf32>
    %cst_23 = arith.constant dense<0.000000e+00> : vector<16xf32>
    %36 = vector.multi_reduction <add>, %35, %cst_23 [0] : vector<64x16xf32> to vector<16xf32>
    %37 = vector.shape_cast %36 : vector<16xf32> to vector<1x16xf32>
    %c0_24 = arith.constant 0 : index
    %c1_25 = arith.constant 1 : index
    %c0_26 = arith.constant 0 : index
    %38 = vector.load %arg4[%c0_24, %c1_25, %c0_26] : memref<1x2x16xf32, #tpu.memory_space<vmem>>, vector<1x1x16xf32>
    %39 = vector.shape_cast %38 : vector<1x1x16xf32> to vector<1x16xf32>
    %40 = vector.shape_cast %37 : vector<1x16xf32> to vector<1x1x16xf32>
    tpu.vector_store %arg4[%c0_24, %c1_25, %c0_26], %40 {strides = array<i32>} : memref<1x2x16xf32, #tpu.memory_space<vmem>>, vector<1x1x16xf32>,
    return
  }
  func.func @transform_0(%arg0: i32) -> (i32, i32, i32, i32) {
    %c0_i32 = arith.constant 0 : i32
    %c0_i32_0 = arith.constant 0 : i32
    %c0_i32_1 = arith.constant 0 : i32
    %c0_i32_2 = arith.constant 0 : i32
    return %arg0, %c0_i32, %c0_i32_0, %c0_i32_1 : i32, i32, i32, i32
  }
  func.func @transform_1(%arg0: i32) -> (i32, i32, i32) {
    %c0_i32 = arith.constant 0 : i32
    %c0_i32_0 = arith.constant 0 : i32
    %c0_i32_1 = arith.constant 0 : i32
    %c0_i32_2 = arith.constant 0 : i32
    return %c0_i32, %c0_i32_0, %c0_i32_1 : i32, i32, i32
  }
  func.func @transform_2(%arg0: i32) -> (i32, i32, i32) {
    %c0_i32 = arith.constant 0 : i32
    %c0_i32_0 = arith.constant 0 : i32
    %c0_i32_1 = arith.constant 0 : i32
    return %arg0, %c0_i32, %c0_i32_0 : i32, i32, i32
  }
  func.func @transform_3(%arg0: i32) -> (i32, i32, i32) {
    %c0_i32 = arith.constant 0 : i32
    %c0_i32_0 = arith.constant 0 : i32
    %c0_i32_1 = arith.constant 0 : i32
    return %arg0, %c0_i32, %c0_i32_0 : i32, i32, i32
  }
}

</mosaic_0001>

<bundles_post_ra>
// kernel: down_forward.3
= control target key start
LH: loop header
LB: loop body
LE: loop exit
PB: predicated region body
PF: predicated region fallthrough
CT: control target
= control target key end

     0   :  { %7 = vsyncpa [#allocation3], 0  ;;  %s525_s0 = inlined_call_operand.vmem [shape: f32[2,64,16], index: 0, kind: input, shape index: {}]   ;;  %s526_s1 = inlined_call_operand.vmem [shape: f32[2,16], index: 1, kind: input, shape index: {}]   ;;  %s527_s2 = inlined_call_operand.hbm [shape: f32[2,64,16], index: 2, kind: output, shape index: {}]  }
   0x1   :  { %9 = vsyncpa [#allocation3 + $0x1], 0  ;;  %s419_s9 = smov 0   ;;  %s421_s10 = smov 0  }
   0x2   :  { %s423_s11 = smov 0   ;;  %s425_s12 = smov 0  }
   0x3 LB: > { %s440_s13 = sadd.s32 4294967295, %s400_s12   ;;  %s281_s14 = sadd.s32 4294967294, %s400_s12   ;;  %s400_s12 = sphi %s425_s12, %s533_s12   ;;  %s396_s11 = sphi %s423_s11, %s532_s11   ;;  %s392_s10 = sphi %s421_s10, %s531_s10   ;;  %s388_s9 = sphi %s419_s9, %s530_s9  }
   0x4   : > { %s444_s15 = sadd.s32 1, %s400_s12   ;;  %s69_s16 = sadd.s32 1, %s396_s11 }
   0x5   : > { %s66_s17 = ssub.s32 %s400_s12, %s444_s15  ;;  %p79_p0 = scmp.ne.s32.totalorder %s396_s11, %s392_s10 }
   0x6   : > { %p67_p1 = scmp.eq.s32.totalorder %s66_s17, 0  ;;  %p80_p2 = scmp.eq.s32.totalorder %s440_s13, 1 }
   0x7   : > { %p85_p3 = scmp.ne.s32.totalorder %s392_s10, %s388_s9  ;;  %p86_p4 = scmp.eq.s32.totalorder %s281_s14, 1 }
   0x8   : > { %s455_s18 = scalar_select %p67_p1, %s396_s11, %s69_s16  }
   0x9   : > { %p457_p5 = por %p80_p2, %p79_p0  ;;  %p461_p6 = por %p86_p4, %p85_p3 }
   0xa   : > { %p284_p7 = scmp.ge.s32.totalorder %s400_s12, 1  ;;  %p115_p8 = scmp.lt.s32.totalorder %s400_s12, 3 }
   0xc   : > { %p116_p9 = pnand %p284_p7, %p115_p8 }
   0xd   : > { %p137_p10 = scmp.lt.s32.totalorder (!%p116_p9), %s440_s13, 1  ;;  %s134_s24 = sand.u32 (!%p116_p9), 1, %s392_s10  }
   0xe   : > { %119 = sbr.rel (%p116_p9) target bundleno = 42 (0x2a), region = 28  ;;  %s481_s3 = sshll.u32 (!%p116_p9), %s134_s24, 6 }
   0xf   : > { %s294_s4 = sshll.u32 (!%p116_p9), %s440_s13, 6  ;;  %s136_s8 = scalar_lea.vmem (!%p116_p9), [#allocation2], %s481_s3 }
  0x10   : > { %s215_s7 = scalar_lea.hbm (!%p116_p9), %s527_s2, %s294_s4  ;;  %s204_s16 = scalar_lea.sflag (!%p116_p9), [#allocation3], %s134_s24 }
  0x11   : > { %s218_s14 = sshll.u32 (!%p116_p9), %s215_s7, 4  ;;  %s219_s14 = int_to_ptr.hbm [resolvable:$true] %s218_s14 }
  0x12   : > { %s352_s17 = sshra.s32 (!%p116_p9), %s219_s14, 4  ;;  %s353_s17 = int_to_ptr.hbm [resolvable:$true] %s352_s17 }
  0x13   : > { %s138_s21 = scalar_select %p137_p10, %s440_s13, 1  ;;  %v336_v0 = vld [vmem:[%s526_s1] ss:$0 sm:$0xff]  ;;  %v337_v1 = vld [vmem:[%s526_s1 + $0x1] ss:$0 sm:$0xff]  ;;  %vm194_vm0 = vcmask 130048  }
  0x14   : > { %s216_s13 = sshll.u32 %s136_s8, 4  ;;  %p359_p0 = scmp.lt.s32.totalorder %s353_s17, %s527_s2  ;;  %s217_s13 = int_to_ptr.vmem [resolvable:$true] %s216_s13 }
  0x15   : > { %s293_s25 = sshll.u32 %s138_s21, 6  ;;  %s354_s21 = scalar_lea.hbm %s353_s17, 64 }
  0x16   : > { %s141_s28 = scalar_lea.vmem %s525_s0, %s293_s25  ;;  %p355_p11 = scmp.ne.s32.totalorder %s353_s17, %s354_s21 }
  0x17   : > { %v142_v2 = vld [vmem:[%s141_s28] sm:$0xff]  ;;  %v143_v3 = vld [vmem:[%s141_s28 + $0x8] sm:$0xff]  ;;  %v144_v4 = vld [vmem:[%s141_s28 + $0x10] sm:$0xff]  ;;  %s358_s25 = scalar_lea.hbm %s527_s2, 128 }
  0x18   : > { %v152_v5 = vmul.f32 %v336_v0, %v142_v2  ;;  %v153_v6 = vmul.f32 %v336_v0, %v143_v3  ;;  %v154_v7 = vmul.f32 %v336_v0, %v144_v4  ;;  %v145_v8 = vld [vmem:[%s141_s28 + $0x18] sm:$0xff]  ;;  %v146_v9 = vld [vmem:[%s141_s28 + $0x20] sm:$0xff]  ;;  %v147_v10 = vld [vmem:[%s141_s28 + $0x28] sm:$0xff]  ;;  %p356_p12 = pnand %p355_p11, %p457_p5  ;;  %p360_p1 = scmp.lt.s32.totalorder %s358_s25, %s354_s21 }
  0x19   : > { %v155_v11 = vmul.f32 %v336_v0, %v145_v8  ;;  %v156_v12 = vmul.f32 %v336_v0, %v146_v9  ;;  %v157_v13 = vmul.f32 %v336_v0, %v147_v10  ;;  %v148_v14 = vld [vmem:[%s141_s28 + $0x30] sm:$0xff]  ;;  %v149_v15 = vld [vmem:[%s141_s28 + $0x38] sm:$0xff] }
  0x1a   : > { %v162_v16 = vadd.f32 %v337_v1, %v152_v5  ;;  %v163_v17 = vadd.f32 %v337_v1, %v153_v6  ;;  %v164_v18 = vadd.f32 %v337_v1, %v154_v7  ;;  %v158_v19 = vmul.f32 %v336_v0, %v148_v14  ;;  %p357_p13 = pneg %p356_p12  ;;  %p361_p2 = por %p360_p1, %p359_p0 }
  0x1b   : > { %v165_v20 = vadd.f32 %v337_v1, %v155_v11  ;;  %v166_v21 = vadd.f32 %v337_v1, %v156_v12  ;;  %v167_v22 = vadd.f32 %v337_v1, %v157_v13  ;;  %v159_v23 = vmul.f32 %v336_v0, %v149_v15 }
  0x1c   : > { %vm170_vm1 = vcmp.gt.f32.partialorder %v162_v16, 0.0  ;;  %v178_v24 = vmul.f32 0.2, %v162_v16  ;;  %vm171_vm2 = vcmp.gt.f32.partialorder %v163_v17, 0.0  ;;  %v179_v25 = vmul.f32 0.2, %v163_v17  ;;  %p362_p3 = pnand %p361_p2, %p357_p13 }
  0x1d   : > { %vm172_vm3 = vcmp.gt.f32.partialorder %v164_v18, 0.0  ;;  %v180_v26 = vmul.f32 0.2, %v164_v18  ;;  %vm173_vm4 = vcmp.gt.f32.partialorder %v165_v20, 0.0  ;;  %v181_v27 = vmul.f32 0.2, %v165_v20 }
  0x1e   : > { %v186_v28 = vsel %vm170_vm1, %v162_v16, %v178_v24  ;;  %v187_v29 = vsel %vm171_vm2, %v163_v17, %v179_v25  ;;  %vm174_vm5 = vcmp.gt.f32.partialorder %v166_v21, 0.0  ;;  %v182_v30 = vmul.f32 0.2, %v166_v21 }
  0x1f   : > { %195 = vst.msk [vmem:[%s136_s8] sm:$0xff] %vm194_vm0, %v186_v28  ;;  %v188_v31 = vsel %vm172_vm3, %v164_v18, %v180_v26  ;;  %v189_v32 = vsel %vm173_vm4, %v165_v20, %v181_v27  ;;  %vm175_vm6 = vcmp.gt.f32.partialorder %v167_v22, 0.0  ;;  %v183_v33 = vmul.f32 0.2, %v167_v22 }
  0x20   : > { %196 = vst.msk [vmem:[%s136_s8 + $0x8] sm:$0xff] %vm194_vm0, %v187_v29  ;;  %v190_v34 = vsel %vm174_vm5, %v166_v21, %v182_v30  ;;  %v168_v35 = vadd.f32 %v337_v1, %v158_v19  ;;  %v169_v36 = vadd.f32 %v337_v1, %v159_v23 }
  0x21   : > { %197 = vst.msk [vmem:[%s136_s8 + $0x10] sm:$0xff] %vm194_vm0, %v188_v31  ;;  %v191_v37 = vsel %vm175_vm6, %v167_v22, %v183_v33 }
  0x22   : > { %198 = vst.msk [vmem:[%s136_s8 + $0x18] sm:$0xff] %vm194_vm0, %v189_v32  ;;  %vm176_vm7 = vcmp.gt.f32.partialorder %v168_v35, 0.0  ;;  %v184_v38 = vmul.f32 0.2, %v168_v35  ;;  %vm177_vm8 = vcmp.gt.f32.partialorder %v169_v36, 0.0 }
  0x23   : > { %199 = vst.msk [vmem:[%s136_s8 + $0x20] sm:$0xff] %vm194_vm0, %v190_v34  ;;  %v185_v39 = vmul.f32 0.2, %v169_v36 }
  0x24   : > { %200 = vst.msk [vmem:[%s136_s8 + $0x28] sm:$0xff] %vm194_vm0, %v191_v37  ;;  %v192_v40 = vsel %vm176_vm7, %v168_v35, %v184_v38 }
  0x25   : > { %201 = vst.msk [vmem:[%s136_s8 + $0x30] sm:$0xff] %vm194_vm0, %v192_v40  ;;  %v193_v41 = vsel %vm177_vm8, %v169_v36, %v185_v39 }
  0x26   : > { %202 = vst.msk [vmem:[%s136_s8 + $0x38] sm:$0xff] %vm194_vm0, %v193_v41 }
  0x27   : > { %365 = shalt.err (!%p362_p3)
}
  0x28   : > { %s402_s24 = smov 128   ;;  %s403_s28 = smov 8  }
  0x29   : > { %295 = dma.vmem_to_hbm [thread:$0]  (%p457_p5), %s217_s13, 1024, %s219_s14, %s204_s16, %s402_s24, %s402_s24, %s403_s28  }
  0x2a PF: > { %p301_p4 = scmp.ge.s32.totalorder %s400_s12, 2  ;;  %s233_s29 = sand.u32 1, %s388_s9  }
  0x2b   : > { %s234_s30 = scalar_lea.sflag [#allocation3], %s233_s29 }
  0x2c   : > { %p298_p7 = pnand %p301_p4, %p461_p6 }
  0x2e   : > { %p299_p8 = pneg %p298_p7 }
  0x30   : > { %383 = dma.done.wait (%p299_p8), %s234_s30, 1024  }
  0x31   : > { %385 = vsyncadd (%p299_p8), %s234_s30, 4294966272  ;;  %p12_p9 = scmp.ge.s32.totalorder %s444_s15, 4   ;;  %s530_s9 = smov %s392_s10 }
  0x32   : > { %s531_s10 = smov %s396_s11  ;;  %s532_s11 = smov %s455_s18 }
  0x33   : > { %s533_s12 = smov %s444_s15  ;;  %14 = sbr.rel (!%p12_p9) target bundleno = 3 (0x3), region = 63 }
  0x38   :  { %240 = vsyncpa [#allocation3], 1 }
  0x39   :  { %242 = vsyncpa [#allocation3 + $0x1], 1 }

// kernel: down_forward.2
= control target key start
LH: loop header
LB: loop body
LE: loop exit
PB: predicated region body
PF: predicated region fallthrough
CT: control target
= control target key end

     0   :  { %s827_s12 = smov 0   ;;  %s977_s0 = inlined_call_operand.vmem [shape: bf16[2,9,9,16], index: 0, kind: input, shape index: {}]   ;;  %s978_s1 = inlined_call_operand.vmem [shape: bf16[4,16,16], index: 1, kind: input, shape index: {}]   ;;  %s979_s2 = inlined_call_operand.vmem [shape: f32[2,64,16], index: 2, kind: output, shape index: {0}]   ;;  %s980_s3 = inlined_call_operand.vmem [shape: f32[2,2,16], index: 3, kind: output, shape index: {1}]  }
   0x1 LB: > { %s736_s13 = sadd.s32 4294967295, %s805_s12   ;;  %p740_p0 = scmp.ge.s32.totalorder %s805_s12, 1  ;;  %s805_s12 = sphi %s827_s12, %s14_s12  }
   0x2   : > { %p140_p1 = scmp.lt.s32.totalorder %s805_s12, 3 }
   0x4   : > { %p141_p2 = pnand %p740_p0, %p140_p1 }
   0x5   : > { %p168_p3 = scmp.lt.s32.totalorder (!%p141_p2), %s736_s13, 1 }
   0x6   : > { %144 = sbr.rel (%p141_p2) target bundleno = 238 (0xee), region = 28 }
   0xb   : > { %v788_v0 = vld [vmem:[%s978_s1 + $0x10] sm:$0xff]  ;;  %v786_v1 = vld [vmem:[%s978_s1] sm:$0xff]  ;;  %v787_v2 = vld [vmem:[%s978_s1 + $0x8] sm:$0xff]  ;;  %s984_s13 = smov (!%p168_p3, %s736_s13), 1  ;;  %vm339_vm0 = vcmask 130048   ;;  %vm618_vm4 = vcmask 122880  }
   0xc   : > { %v789_v3 = vld [vmem:[%s978_s1 + $0x18] sm:$0xff]  ;;  %482 = vmatpush.bf16.msra.mxu2 %v788_v0  ;;  %426 = vmatpush.bf16.msra.mxu1 %v786_v1  ;;  %s790_s22 = smul.u32 72, %s984_s13  ;;  %vm203_vm1 = vsmask.f32 3328  ;;  %vm204_vm2 = vsmask.f32 7440 }
   0xd   : > { %359 = vmatpush.bf16.msra.mxu0 %v787_v2  ;;  %559 = vmatpush.bf16.msra.mxu3 %v789_v3  ;;  %vm872_vm3 = vmor %vm203_vm1, %vm204_vm2  ;;  %s785_s26 = sshll.u32 %s984_s13, 6  ;;  %s744_s30 = sshll.u32 %s984_s13, 1 }
   0xe   : > { %s853_s25 = scalar_lea.vmem %s977_s0, %s790_s22  ;;  %s936_s29 = scalar_lea.vmem %s979_s2, %s785_s26 }
   0xf   : > { %v185_v4 = vld [vmem:[%s853_s25 + $0x8] sm:$0xf]  ;;  %v857_v5 = vld [vmem:[%s853_s25 + $0x10] sm:$0xf]  ;;  %v183_v6 = vld [vmem:[%s853_s25] sm:$0xf]  ;;  %s181_s6 = scalar_lea.vmem %s980_s3, %s744_s30 }
  0x10   : > { %v221_v7 = vshrl.u32 %v185_v4, 16  ;;  %v224_v8 = vshll.u32 %v185_v4, 16  ;;  %v235_v9 = vshrl.u32 %v857_v5, 16  ;;  %v238_v10 = vshll.u32 %v857_v5, 16  ;;  %v184_v11 = vld [vmem:[%s853_s25 + $0x4] sm:$0x1] }
  0x11   : > { %v390_v12 = vunpack.c.l.b16 %v185_v4  ;;  %v391_v13 = vunpack.c.l.b16 %v857_v5  ;;  %v207_v14 = vshrl.u32 %v183_v6, 16  ;;  %v210_v15 = vshll.u32 %v183_v6, 16  ;;  %v186_v16 = vld [vmem:[%s853_s25 + $0xc] sm:$0x1]  ;;  %v188_v17 = vld [vmem:[%s853_s25 + $0x14] sm:$0x1] }
  0x12   : > { %v223_v18 = vrot.slane %v221_v7, 4  ;;  %v226_v19 = vrot.slane %v224_v8, 5  ;;  %v237_v20 = vrot.slane %v235_v9, 4  ;;  %v240_v21 = vrot.slane %v238_v10, 5  ;;  %v189_v22 = vld [vmem:[%s853_s25 + $0x18] sm:$0xf] }
  0x13   : > { %v453_v23 = vpack.c.b16 %v391_v13, %v390_v12  ;;  %v209_v24 = vrot.slane %v207_v14, 4  ;;  %v212_v25 = vrot.slane %v210_v15, 5  ;;  %v389_v26 = vunpack.c.l.b16 %v183_v6  ;;  %v877_v35 = vld [vmem:[%s853_s25 + $0x20] sm:$0xf]  ;;  %v190_v48 = vld [vmem:[%s853_s25 + $0x1c] sm:$0x1] }
  0x14   : > { %v216_v27 = vshll.u32 %v184_v11, 16  ;;  %v227_v28 = vor.u32 %v226_v19, %v223_v18  ;;  %v230_v29 = vshll.u32 %v186_v16, 16  ;;  %v241_v30 = vor.u32 %v240_v21, %v237_v20  ;;  %v192_v53 = vld [vmem:[%s853_s25 + $0x24] sm:$0x1]  ;;  %v193_v7 = vld [vmem:[%s853_s25 + $0x28] sm:$0xf] }
  0x15   : > { %769 = vmatmul.msk.bf16.vlgmr.msra.gmra.mxu2 %vm339_vm0, %v453_v23  ;;  %v397_v31 = vpack.c.b16 %v390_v12, %v389_v26  ;;  %v213_v33 = vor.u32 %v212_v25, %v209_v24  ;;  %v244_v34 = vshll.u32 %v188_v17, 16  ;;  %v249_v36 = vshrl.u32 %v189_v22, 16  ;;  %v895_v8 = vld [vmem:[%s853_s25 + $0x30] sm:$0xf]  ;;  %v196_v23 = vld [vmem:[%s853_s25 + $0x34] sm:$0x1] }
  0x16   : > { %v218_v37 = vrot.slane %v216_v27, 5  ;;  %v228_v38 = vrot.slane %v227_v28, 4  ;;  %v232_v39 = vrot.slane %v230_v29, 5  ;;  %v242_v40 = vrot.slane %v241_v30, 4 }
  0x17   : > { %759 = vmatmul.msk.bf16.vlgmr.msra.gmra.mxu1 %vm339_vm0, %v397_v31  ;;  %v214_v41 = vrot.slane %v213_v33, 4  ;;  %v246_v42 = vrot.slane %v244_v34, 5  ;;  %v251_v43 = vrot.slane %v249_v36, 4  ;;  %v252_v44 = vshll.u32 %v189_v22, 16 }
  0x18   : > { %v233_v45 = vsel %vm872_vm3, %v228_v38, %v232_v39  ;;  %v263_v46 = vshrl.u32 %v877_v35, 16  ;;  %v266_v47 = vshll.u32 %v877_v35, 16  ;;  %v258_v59 = vshll.u32 %v190_v48, 16  ;;  %v199_v38 = vld [vmem:[%s853_s25 + $0x40] sm:$0xf] }
  0x19   : > { %v219_v49 = vsel %vm872_vm3, %v214_v41, %v218_v37  ;;  %v322_v50 = vunpack.c.l.b16 %v233_v45  ;;  %v247_v51 = vsel %vm872_vm3, %v242_v40, %v246_v42  ;;  %v254_v52 = vrot.slane %v252_v44, 5  ;;  %v197_v37 = vld [vmem:[%s853_s25 + $0x38] sm:$0xf] }
  0x1a   : > { %v321_v54 = vunpack.c.l.b16 %v219_v49  ;;  %v323_v55 = vunpack.c.l.b16 %v247_v51  ;;  %v265_v56 = vrot.slane %v263_v46, 4  ;;  %v268_v57 = vrot.slane %v266_v47, 5 }
  0x1b   : > { %v255_v58 = vor.u32 %v254_v52, %v251_v43  ;;  %v272_v63 = vshll.u32 %v192_v53, 16  ;;  %v392_v0 = vunpack.c.l.b16 %v189_v22  ;;  %v393_v1 = vunpack.c.l.b16 %v877_v35  ;;  %v194_v22 = vld [vmem:[%s853_s25 + $0x2c] sm:$0x1]  ;;  %v198_v53 = vld [vmem:[%s853_s25 + $0x3c] sm:$0x1] }
  0x1c   : > { %v329_v60 = vpack.c.b16 %v322_v50, %v321_v54  ;;  %v530_v61 = vpack.c.b16 %v323_v55, %v322_v50  ;;  %v269_v62 = vor.u32 %v268_v57, %v265_v56  ;;  %v260_v3 = vrot.slane %v258_v59, 5  ;;  %v200_v54 = vld [vmem:[%s853_s25 + $0x44] sm:$0x1] }
  0x1d   : > { %v256_v2 = vrot.slane %v255_v58, 4  ;;  %v274_v6 = vrot.slane %v272_v63, 5  ;;  %v454_v9 = vpack.c.b16 %v393_v1, %v392_v0  ;;  %v398_v10 = vpack.c.b16 %v392_v0, %v391_v13 }
  0x1e   : > { %751 = vmatmul.msk.bf16.vlgmr.msra.gmra.mxu0 %vm339_vm0, %v329_v60  ;;  %779 = vmatmul.msk.bf16.vlgmr.msra.gmra.mxu3 %vm339_vm0, %v530_v61  ;;  %v270_v4 = vrot.slane %v269_v62, 4  ;;  %v277_v11 = vshrl.u32 %v193_v7, 16  ;;  %v280_v12 = vshll.u32 %v193_v7, 16  ;;  %v291_v16 = vshrl.u32 %v895_v8, 16 }
  0x1f   : > { %v261_v14 = vsel %vm872_vm3, %v256_v2, %v260_v3  ;;  %v294_v17 = vshll.u32 %v895_v8, 16  ;;  %v286_v27 = vshll.u32 %v194_v22, 16  ;;  %v300_v29 = vshll.u32 %v196_v23, 16 }
  0x20   : > { %v275_v15 = vsel %vm872_vm3, %v270_v4, %v274_v6  ;;  %v324_v18 = vunpack.c.l.b16 %v261_v14  ;;  %v279_v5 = vrot.slane %v277_v11, 4  ;;  %v282_v13 = vrot.slane %v280_v12, 5 }
  0x21   : > { %v325_v19 = vunpack.c.l.b16 %v275_v15  ;;  %v293_v20 = vrot.slane %v291_v16, 4  ;;  %v296_v21 = vrot.slane %v294_v17, 5  ;;  %v394_v30 = vunpack.c.l.b16 %v193_v7 }
  0x22   : > { %v330_v24 = vpack.c.b16 %v324_v18, %v323_v55  ;;  %v283_v26 = vor.u32 %v282_v13, %v279_v5  ;;  %v395_v31 = vunpack.c.l.b16 %v895_v8  ;;  %v288_v34 = vrot.slane %v286_v27, 5 }
  0x23   : > { %v531_v25 = vpack.c.b16 %v325_v19, %v324_v18  ;;  %v297_v28 = vor.u32 %v296_v21, %v293_v20  ;;  %v302_v36 = vrot.slane %v300_v29, 5  ;;  %v399_v40 = vpack.c.b16 %v394_v30, %v393_v1 }
  0x24   : > { %v284_v33 = vrot.slane %v283_v26, 4  ;;  %v455_v39 = vpack.c.b16 %v395_v31, %v394_v30  ;;  %v305_v41 = vshrl.u32 %v197_v37, 16  ;;  %v308_v42 = vshll.u32 %v197_v37, 16 }
  0x25   : > { %770 = vmatmul.msk.bf16.gmra.mxu2 %vm339_vm0, %v454_v9  ;;  %v298_v35 = vrot.slane %v297_v28, 4  ;;  %v513_v45 = vshrl.u32 %v199_v38, 16  ;;  %v516_v46 = vshll.u32 %v199_v38, 16  ;;  %v314_v58 = vshll.u32 %v198_v53, 16 }
  0x26   : > { %v289_v43 = vsel %vm872_vm3, %v284_v33, %v288_v34  ;;  %v307_v49 = vrot.slane %v305_v41, 4  ;;  %v310_v50 = vrot.slane %v308_v42, 5  ;;  %v522_v60 = vshll.u32 %v200_v54, 16 }
  0x27   : > { %760 = vmatmul.msk.bf16.gmra.mxu1 %vm339_vm0, %v398_v10  ;;  %v303_v44 = vsel %vm872_vm3, %v298_v35, %v302_v36  ;;  %v326_v47 = vunpack.c.l.b16 %v289_v43  ;;  %v515_v51 = vrot.slane %v513_v45, 4  ;;  %v518_v52 = vrot.slane %v516_v46, 5 }
  0x28   : > { %v327_v48 = vunpack.c.l.b16 %v303_v44  ;;  %v311_v57 = vor.u32 %v310_v50, %v307_v49  ;;  %v396_v61 = vunpack.c.l.b16 %v197_v37  ;;  %v452_v62 = vunpack.c.l.b16 %v199_v38 }
  0x29   : > { %v331_v55 = vpack.c.b16 %v326_v47, %v325_v19  ;;  %v519_v59 = vor.u32 %v518_v52, %v515_v51  ;;  %v316_v0 = vrot.slane %v314_v58, 5  ;;  %v524_v2 = vrot.slane %v522_v60, 5 }
  0x2a   : > { %v532_v56 = vpack.c.b16 %v327_v48, %v326_v47  ;;  %v312_v63 = vrot.slane %v311_v57, 4  ;;  %v456_v3 = vpack.c.b16 %v452_v62, %v396_v61  ;;  %v400_v4 = vpack.c.b16 %v396_v61, %v395_v31 }
  0x2b   : > { %v520_v1 = vrot.slane %v519_v59, 4 }
  0x2c   : > { %v317_v6 = vsel %vm872_vm3, %v312_v63, %v316_v0 }
  0x2d   : > { %v525_v7 = vsel %vm872_vm3, %v520_v1, %v524_v2  ;;  %v328_v8 = vunpack.c.l.b16 %v317_v6 }
  0x2e   : > { %752 = vmatmul.msk.bf16.gmra.mxu0 %vm339_vm0, %v330_v24  ;;  %780 = vmatmul.msk.bf16.gmra.mxu3 %vm339_vm0, %v531_v25  ;;  %v529_v9 = vunpack.c.l.b16 %v525_v7 }
  0x2f   : > { %v332_v10 = vpack.c.b16 %v328_v8, %v327_v48 }
  0x30   : > { %v533_v11 = vpack.c.b16 %v529_v9, %v328_v8 }
  0x35   : > { %771 = vmatmul.msk.bf16.gmra.mxu2 %vm339_vm0, %v455_v39 }
  0x37   : > { %761 = vmatmul.msk.bf16.gmra.mxu1 %vm339_vm0, %v399_v40 }
  0x3e   : > { %753 = vmatmul.msk.bf16.gmra.mxu0 %vm339_vm0, %v331_v55  ;;  %781 = vmatmul.msk.bf16.gmra.mxu3 %vm339_vm0, %v532_v56 }
  0x45   : > { %772 = vmatmul.msk.bf16.gmra.mxu2 %vm339_vm0, %v456_v3 }
  0x47   : > { %762 = vmatmul.msk.bf16.gmra.mxu1 %vm339_vm0, %v400_v4 }
  0x4e   : > { %754 = vmatmul.msk.bf16.gmra.mxu0 %vm339_vm0, %v332_v10  ;;  %782 = vmatmul.msk.bf16.gmra.mxu3 %vm339_vm0, %v533_v11 }
  0x94   : > { %v428_v12 = vpop.f32.mrf.mxu1 }
  0x98   : > { %v484_v14 = vpop.f32.mrf.mxu2 }
  0x9b   : > { %v361_v15 = vpop.f32.mrf.mxu0 }
  0x9c   : > { %v429_v16 = vadd.f32 %v428_v12, %v361_v15  ;;  %v430_v17 = vpop.f32.mrf.mxu1 }
  0x9e   : > { %v504_v32 = vadd.f32 %v484_v14, %v429_v16 }
  0xa0   : > { %v486_v18 = vpop.f32.mrf.mxu2 }
  0xa1   : > { %v561_v19 = vpop.f32.mrf.mxu3 }
  0xa2   : > { %v581_v5 = vadd.f32 %v561_v19, %v504_v32 }
  0xa3   : > { %v363_v13 = vpop.f32.mrf.mxu0 }
  0xa4   : > { %589 = vst.msk [vmem:[%s936_s29] sm:$0xff] %vm339_vm0, %v581_v5  ;;  %v431_v20 = vadd.f32 %v430_v17, %v363_v13  ;;  %v433_v21 = vpop.f32.mrf.mxu1  ;;  %v620_v57 = vmul.f32 %v581_v5, %v581_v5  ;;  %v597_v62 = vsel %vm339_vm0, %v581_v5, 0.0 }
  0xa6   : > { %v505_v23 = vadd.f32 %v486_v18, %v431_v20  ;;  %v628_v2 = vsel %vm339_vm0, %v620_v57, 0.0 }
  0xa8   : > { %v489_v22 = vpop.f32.mrf.mxu2 }
  0xa9   : > { %v563_v24 = vpop.f32.mrf.mxu3 }
  0xaa   : > { %v582_v25 = vadd.f32 %v563_v24, %v505_v23 }
  0xab   : > { %v366_v26 = vpop.f32.mrf.mxu0 }
  0xac   : > { %590 = vst.msk [vmem:[%s936_s29 + $0x8] sm:$0xff] %vm339_vm0, %v582_v25  ;;  %v434_v27 = vadd.f32 %v433_v21, %v366_v26  ;;  %v435_v28 = vpop.f32.mrf.mxu1  ;;  %v621_v55 = vmul.f32 %v582_v25, %v582_v25  ;;  %v598_v59 = vsel %vm339_vm0, %v582_v25, 0.0 }
  0xad   : > { %v599_v3 = vadd.f32 %v598_v59, %v597_v62 }
  0xae   : > { %v506_v29 = vadd.f32 %v489_v22, %v434_v27  ;;  %v629_v63 = vsel %vm339_vm0, %v621_v55, 0.0 }
  0xaf   : > { %v630_v10 = vadd.f32 %v629_v63, %v628_v2 }
  0xb0   : > { %v491_v30 = vpop.f32.mrf.mxu2 }
  0xb1   : > { %v566_v31 = vpop.f32.mrf.mxu3 }
  0xb2   : > { %v583_v33 = vadd.f32 %v566_v31, %v506_v29 }
  0xb3   : > { %v368_v34 = vpop.f32.mrf.mxu0 }
  0xb4   : > { %591 = vst.msk [vmem:[%s936_s29 + $0x10] sm:$0xff] %vm339_vm0, %v583_v33  ;;  %v436_v35 = vadd.f32 %v435_v28, %v368_v34  ;;  %v438_v36 = vpop.f32.mrf.mxu1  ;;  %v622_v60 = vmul.f32 %v583_v33, %v583_v33  ;;  %v600_v0 = vsel %vm339_vm0, %v583_v33, 0.0 }
  0xb5   : > { %v601_v11 = vadd.f32 %v600_v0, %v599_v3 }
  0xb6   : > { %v507_v37 = vadd.f32 %v491_v30, %v436_v35  ;;  %v631_v6 = vsel %vm339_vm0, %v622_v60, 0.0 }
  0xb7   : > { %v632_v18 = vadd.f32 %v631_v6, %v630_v10 }
  0xb8   : > { %v494_v38 = vpop.f32.mrf.mxu2 }
  0xb9   : > { %v568_v39 = vpop.f32.mrf.mxu3 }
  0xba   : > { %v584_v40 = vadd.f32 %v568_v39, %v507_v37 }
  0xbb   : > { %v371_v41 = vpop.f32.mrf.mxu0 }
  0xbc   : > { %592 = vst.msk [vmem:[%s936_s29 + $0x18] sm:$0xff] %vm339_vm0, %v584_v40  ;;  %v439_v42 = vadd.f32 %v438_v36, %v371_v41  ;;  %v440_v44 = vpop.f32.mrf.mxu1  ;;  %v623_v1 = vmul.f32 %v584_v40, %v584_v40  ;;  %v602_v7 = vsel %vm339_vm0, %v584_v40, 0.0 }
  0xbd   : > { %v603_v19 = vadd.f32 %v602_v7, %v601_v11 }
  0xbe   : > { %v508_v43 = vadd.f32 %v494_v38, %v439_v42  ;;  %v633_v15 = vsel %vm339_vm0, %v623_v1, 0.0 }
  0xbf   : > { %v634_v21 = vadd.f32 %v633_v15, %v632_v18 }
  0xc0   : > { %v496_v47 = vpop.f32.mrf.mxu2 }
  0xc1   : > { %v571_v45 = vpop.f32.mrf.mxu3 }
  0xc2   : > { %v585_v46 = vadd.f32 %v571_v45, %v508_v43 }
  0xc3   : > { %v373_v48 = vpop.f32.mrf.mxu0 }
  0xc4   : > { %593 = vst.msk [vmem:[%s936_s29 + $0x20] sm:$0xff] %vm339_vm0, %v585_v46  ;;  %v441_v49 = vadd.f32 %v440_v44, %v373_v48  ;;  %v443_v51 = vpop.f32.mrf.mxu1  ;;  %v624_v8 = vmul.f32 %v585_v46, %v585_v46  ;;  %v604_v16 = vsel %vm339_vm0, %v585_v46, 0.0 }
  0xc5   : > { %v605_v22 = vadd.f32 %v604_v16, %v603_v19 }
  0xc6   : > { %v509_v50 = vadd.f32 %v496_v47, %v441_v49  ;;  %v635_v5 = vsel %vm339_vm0, %v624_v8, 0.0 }
  0xc7   : > { %v636_v27 = vadd.f32 %v635_v5, %v634_v21 }
  0xc8   : > { %v499_v58 = vpop.f32.mrf.mxu2 }
  0xc9   : > { %v573_v52 = vpop.f32.mrf.mxu3 }
  0xca   : > { %v586_v53 = vadd.f32 %v573_v52, %v509_v50 }
  0xcb   : > { %v376_v54 = vpop.f32.mrf.mxu0 }
  0xcc   : > { %594 = vst.msk [vmem:[%s936_s29 + $0x28] sm:$0xff] %vm339_vm0, %v586_v53  ;;  %v444_v56 = vadd.f32 %v443_v51, %v376_v54  ;;  %v445_v12 = vpop.f32.mrf.mxu1  ;;  %v625_v17 = vmul.f32 %v586_v53, %v586_v53  ;;  %v606_v13 = vsel %vm339_vm0, %v586_v53, 0.0 }
  0xcd   : > { %v607_v28 = vadd.f32 %v606_v13, %v605_v22 }
  0xce   : > { %v510_v61 = vadd.f32 %v499_v58, %v444_v56  ;;  %v637_v24 = vsel %vm339_vm0, %v625_v17, 0.0 }
  0xcf   : > { %v638_v33 = vadd.f32 %v637_v24, %v636_v27 }
  0xd0   : > { %v501_v23 = vpop.f32.mrf.mxu2 }
  0xd1   : > { %v576_v4 = vpop.f32.mrf.mxu3 }
  0xd2   : > { %v587_v9 = vadd.f32 %v576_v4, %v510_v61 }
  0xd3   : > { %v378_v14 = vpop.f32.mrf.mxu0 }
  0xd4   : > { %595 = vst.msk [vmem:[%s936_s29 + $0x30] sm:$0xff] %vm339_vm0, %v587_v9  ;;  %v446_v32 = vadd.f32 %v445_v12, %v378_v14  ;;  %v626_v20 = vmul.f32 %v587_v9, %v587_v9  ;;  %v608_v25 = vsel %vm339_vm0, %v587_v9, 0.0 }
  0xd5   : > { %v609_v34 = vadd.f32 %v608_v25, %v607_v28 }
  0xd6   : > { %v511_v26 = vadd.f32 %v501_v23, %v446_v32  ;;  %v639_v30 = vsel %vm339_vm0, %v626_v20, 0.0 }
  0xd7   : > { %v640_v37 = vadd.f32 %v639_v30, %v638_v33 }
  0xd9   : > { %v578_v29 = vpop.f32.mrf.mxu3 }
  0xda   : > { %v588_v31 = vadd.f32 %v578_v29, %v511_v26 }
  0xdc   : > { %596 = vst.msk [vmem:[%s936_s29 + $0x38] sm:$0xff] %vm339_vm0, %v588_v31  ;;  %v610_v35 = vsel %vm339_vm0, %v588_v31, 0.0  ;;  %v627_v36 = vmul.f32 %v588_v31, %v588_v31 }
  0xdd   : > { %v611_v38 = vadd.f32 %v610_v35, %v609_v34 }
  0xde   : > { %v641_v39 = vsel %vm339_vm0, %v627_v36, 0.0 }
  0xdf   : > { %v612_v40 = vrot.slane %v611_v38, 4  ;;  %v642_v41 = vadd.f32 %v641_v39, %v640_v37 }
  0xe1   : > { %v613_v42 = vadd.f32 %v612_v40, %v611_v38  ;;  %v643_v43 = vrot.slane %v642_v41, 4 }
  0xe3   : > { %v614_v44 = vrot.slane %v613_v42, 2  ;;  %v644_v45 = vadd.f32 %v643_v43, %v642_v41 }
  0xe5   : > { %v615_v46 = vadd.f32 %v614_v44, %v613_v42  ;;  %v645_v47 = vrot.slane %v644_v45, 2 }
  0xe7   : > { %v616_v48 = vrot.slane %v615_v46, 1  ;;  %v646_v49 = vadd.f32 %v645_v47, %v644_v45 }
  0xe9   : > { %v617_v50 = vadd.f32 %v616_v48, %v615_v46  ;;  %v647_v51 = vrot.slane %v646_v49, 1 }
  0xeb   : > { %619 = vst.msk [vmem:[%s181_s6] sm:$0x1] %vm618_vm4, %v617_v50  ;;  %v648_v52 = vadd.f32 %v647_v51, %v646_v49 }
  0xed   : > { %649 = vst.msk [vmem:[%s181_s6 + $0x1] sm:$0x1] %vm618_vm4, %v648_v52 }
  0xee PF: > { %s14_s12 = sadd.s32 1, %s805_s12  }
  0xef   : > { %p11_p4 = scmp.ge.s32.totalorder %s14_s12, 4  }
  0xf1   :  { %13 = sbr.rel (!%p11_p4) target bundleno = 1 (0x1), region = 73 }

</bundles_post_ra>
